<compile_context>
chip_gen: v7x
topology: tpu7x:2x2x1
jax: 0.10.0
libtpu: 0.0.40
codegen_flags: <defaults>
</compile_context>

<pallas_src>
import functools

import jax
import jax.numpy as jnp
from jax import lax
from jax.experimental import pallas as pl
from jax.experimental.pallas import tpu as pltpu


def _round_up(x, m):
    return ((x + m - 1) // m) * m


def _vq_kernel(b_valid, e_valid, mask_rows,
               x_ref, w_ref, wq_ref, w2_ref,
               quant_ref, enc_ref, stats_ref):
    """One batch tile of the VQ forward.

    x_ref:     (TB, K)       f32  flattened input tile
    w_ref:     (E_pad, K)    f32  codebook (constant block, VMEM-resident)
    wq_ref:    (E_pad, K)    dist-dtype codebook copy for the distance matmul
    w2_ref:    (1, E_pad)    f32  precomputed ||w||^2 (padded cols are 0)
    quant_ref: (TB, K)       f32  quantized rows
    enc_ref:   (TB, E_pad)   f32  one-hot encodings
    stats_ref: (1, 8, E_pad) f32  sublane 0 = per-tile column sums of enc,
                                  sublanes 1..7 = per-tile sum((quant - x)^2)
    """
    i = pl.program_id(0)
    x = x_ref[...]                                     # (TB, K) f32
    TB, _ = x.shape
    E_pad = w_ref.shape[0]

    # x . w^T on the MXU in the low-precision dtype, f32 accumulation.
    xw = lax.dot_general(
        x.astype(wq_ref.dtype), wq_ref[...],
        dimension_numbers=(((1,), (1,)), ((), ())),
        preferred_element_type=jnp.float32)            # (TB, E_pad)

    # Argmin distance: ||x||^2 is constant per row -> dropped (same argmin).
    col = lax.broadcasted_iota(jnp.int32, (TB, E_pad), 1)
    d = w2_ref[...] - 2.0 * xw
    if e_valid < E_pad:                                # mask padded codes
        d = jnp.where(col < e_valid, d, jnp.float32(3.0e38))

    # First-occurrence argmin -> one-hot encodings (padded batch rows zeroed).
    d_min = jnp.min(d, axis=1, keepdims=True)
    idx = jnp.min(jnp.where(d == d_min, col, E_pad), axis=1, keepdims=True)
    keep = col == idx
    if mask_rows:
        row = lax.broadcasted_iota(jnp.int32, (TB, E_pad), 0) + i * TB
        keep = jnp.logical_and(keep, row < b_valid)
    enc = jnp.where(keep, jnp.float32(1.0), jnp.float32(0.0))
    enc_ref[...] = enc

    # quantized = enc @ W in f32 (copies the selected codebook rows).
    quant = jnp.dot(enc, w_ref[...], preferred_element_type=jnp.float32)
    quant_ref[...] = quant

    # Per-tile reduction stats (finalized in the wrapper; data already in VMEM).
    diff = quant - x                                   # padded rows: 0 - 0
    sq = jnp.sum(diff * diff)                          # scalar
    cs = jnp.sum(enc, axis=0)                          # (E_pad,)
    srow = lax.broadcasted_iota(jnp.int32, (8, E_pad), 0)
    stats_ref[...] = jnp.where(srow == 0, cs[None, :], sq)[None]


def vector_quantizer_forward(inputs, embeddings, commitment_cost, *,
                             tile_b=256, dist_dtype=jnp.bfloat16):
    """Forward pass of VectorQuantizer_Instance_Vr (non-rotate branch).

    inputs:     (B, C, D, H, W) float32 (NCDHW, as in the PyTorch module)
    embeddings: (E, K) float32 with K == C*D*H*W
    Returns (loss, quantized, perplexity, encodings) with the module's forward
    values (straight-through forward value == quantized).
    """
    B, C, D, H, W = inputs.shape
    K = C * D * H * W
    E, Ke = embeddings.shape
    assert Ke == K, "embedding_dim must equal C*D*H*W"

    flat = inputs.reshape(B, K).astype(jnp.float32)
    emb = embeddings.astype(jnp.float32)

    # Lane/sublane alignment: codebook rows padded to 128 lanes, batch padded
    # to a multiple of the (8-aligned) batch tile.
    E_pad = _round_up(E, 128)
    TB = _round_up(min(tile_b, _round_up(B, 8)), 8)
    G = pl.cdiv(B, TB)
    B_pad = G * TB

    if B_pad != B:
        flat = jnp.pad(flat, ((0, B_pad - B), (0, 0)))
    if E_pad != E:
        emb = jnp.pad(emb, ((0, E_pad - E), (0, 0)))

    emb_mm = emb.astype(dist_dtype)                       # for -2*x.w only
    w2 = jnp.sum(emb * emb, axis=1).reshape(1, E_pad)     # hoisted ||w||^2

    kernel = functools.partial(_vq_kernel, B, E, B_pad != B)

    out_shape = (
        jax.ShapeDtypeStruct((B_pad, K), jnp.float32),      # quantized (flat)
        jax.ShapeDtypeStruct((B_pad, E_pad), jnp.float32),  # one-hot encodings
        jax.ShapeDtypeStruct((G, 8, E_pad), jnp.float32),   # per-tile stats
    )

    in_specs = [
        pl.BlockSpec((TB, K), lambda i: (i, 0)),        # x tile (pipelined)
        pl.BlockSpec((E_pad, K), lambda i: (0, 0)),     # codebook f32 (resident)
        pl.BlockSpec((E_pad, K), lambda i: (0, 0)),     # codebook, dist dtype
        pl.BlockSpec((1, E_pad), lambda i: (0, 0)),     # ||w||^2
    ]
    out_specs = [
        pl.BlockSpec((TB, K), lambda i: (i, 0)),
        pl.BlockSpec((TB, E_pad), lambda i: (i, 0)),
        pl.BlockSpec((1, 8, E_pad), lambda i: (i, 0, 0)),
    ]

    itemsize = jnp.dtype(dist_dtype).itemsize
    vmem_need = (4 * (2 * TB * K            # x (double-buffered)
                      + 2 * TB * K          # quant out
                      + 2 * TB * E_pad      # enc out
                      + 2 * 8 * E_pad       # stats out
                      + E_pad               # ||w||^2
                      + E_pad * K)          # codebook f32
                 + itemsize * E_pad * K)    # codebook dist dtype
    vmem_limit = int(min(max(2 * vmem_need, 32 * 1024 * 1024),
                         64 * 1024 * 1024))

    cost = pl.CostEstimate(
        flops=4 * B_pad * E_pad * K,        # distance + gather matmuls
        transcendentals=0,
        bytes_accessed=(4 * B_pad * K * 2 + 4 * E_pad * K
                        + itemsize * E_pad * K + 4 * B_pad * E_pad
                        + 4 * G * 8 * E_pad))

    quant_flat, enc, stats = pl.pallas_call(
        kernel,
        out_shape=out_shape,
        grid=(G,),
        in_specs=in_specs,
        out_specs=out_specs,
        compiler_params=pltpu.CompilerParams(
            dimension_semantics=("parallel",),          # megacore on v7x
            vmem_limit_bytes=vmem_limit),
        cost_estimate=cost,
    )(flat, emb, emb_mm, w2)

    # Tiny epilogue (scalar + (E,)-sized work) in plain JAX.
    sq_total = jnp.sum(stats[:, 1, 0])
    col_sum = jnp.sum(stats[:, 0, :E], axis=0)
    mse = sq_total / (B * K)
    # e_latent_loss == q_latent_loss numerically in the forward pass.
    loss = (1.0 + commitment_cost) * mse
    avg_probs = col_sum / B
    perplexity = jnp.exp(-jnp.sum(avg_probs * jnp.log(avg_probs + 1e-10)))

    # Straight-through: forward value of inputs + (quantized - inputs).detach()
    # is just `quantized`.
    quantized = quant_flat[:B].reshape(B, C, D, H, W)
    encodings = enc[:B, :E]
    return loss, quantized, perplexity, encodings


if __name__ == "__main__":
    # Small shapes consistent with the module: embedding_dim = C*D*H*W.
    # B deliberately not a multiple of the tile and E not a multiple of 128 so
    # the row/column masking paths are exercised.
    B, C, D, H, W = 10, 4, 4, 4, 4
    embedding_dim = C * D * H * W          # 256
    num_embeddings = 96
    commitment_cost = 0.25

    key = jax.random.PRNGKey(0)
    k_x, k_e = jax.random.split(key)

    inputs = jax.random.normal(k_x, (B, C, D, H, W), dtype=jnp.float32)

    # Deterministic codebook init: uniform(-1/E, +1/E), like the module.
    limit = 1.0 / num_embeddings
    embeddings = jax.random.uniform(
        k_e, (num_embeddings, embedding_dim),
        minval=-limit, maxval=limit, dtype=jnp.float32)

    loss, quantized, perplexity, encodings = vector_quantizer_forward(
        inputs, embeddings, commitment_cost, tile_b=8)

    jax.block_until_ready((loss, quantized, perplexity, encodings))

    # ---- validation against the module's forward semantics -----------------
    flat = inputs.reshape(B, -1)

    assert quantized.shape == inputs.shape
    assert encodings.shape == (B, num_embeddings)
    # Exactly one code selected per row.
    assert bool(jnp.all(jnp.sum(encodings, axis=1) == 1.0))

    idx_k = jnp.argmax(encodings, axis=1)

    # The selected code must be (near-)optimal w.r.t. exact f32 distances; the
    # in-kernel distance matmul runs in bf16, so allow a tiny slack that is far
    # below typical inter-code distance gaps.
    xw = lax.dot_general(flat, embeddings, (((1,), (1,)), ((), ())),
                         precision=lax.Precision.HIGHEST)
    w2 = jnp.sum(embeddings ** 2, axis=1)
    dprime = w2[None, :] - 2.0 * xw        # same argmin as full ||x - w||^2
    d_sel = jnp.take_along_axis(dprime, idx_k[:, None], axis=1)[:, 0]
    assert bool(jnp.all(d_sel - jnp.min(dprime, axis=1) <= 5e-3))

    # Quantized rows are the selected codebook rows.
    quant_ref = embeddings[idx_k]
    assert bool(jnp.allclose(quantized.reshape(B, -1), quant_ref,
                             atol=2e-4, rtol=1e-2))

    # Loss / perplexity follow the module's formulas for the selected codes.
    mse_ref = jnp.mean((quant_ref - flat) ** 2)
    loss_ref = (1.0 + commitment_cost) * mse_ref
    enc_ref = jax.nn.one_hot(idx_k, num_embeddings, dtype=jnp.float32)
    avg_ref = jnp.mean(enc_ref, axis=0)
    perp_ref = jnp.exp(-jnp.sum(avg_ref * jnp.log(avg_ref + 1e-10)))
    assert bool(jnp.allclose(encodings, enc_ref))
    assert bool(jnp.allclose(loss, loss_ref, atol=1e-5, rtol=1e-3))
    assert bool(jnp.allclose(perplexity, perp_ref, atol=1e-5, rtol=1e-4))

    print("KERNEL_OK")
</pallas_src>

<mosaic_0001>
module attributes {stable_mosaic.version = 11 : i64} {
  func.func @_vq_kernel(%arg0: i32, %arg1: memref<8x256xf32, #tpu.memory_space<vmem>>, %arg2: memref<128x256xf32, #tpu.memory_space<vmem>>, %arg3: memref<128x256xbf16, #tpu.memory_space<vmem>>, %arg4: memref<1x128xf32, #tpu.memory_space<vmem>>, %arg5: memref<8x256xf32, #tpu.memory_space<vmem>>, %arg6: memref<8x128xf32, #tpu.memory_space<vmem>>, %arg7: memref<1x8x128xf32, #tpu.memory_space<vmem>>) attributes {dimension_semantics = [#tpu.dimension_semantics<parallel>], iteration_bounds = array<i64: 2>, scalar_prefetch = 0 : i64, scratch_operands = 0 : i64, tpu.core_type = #tpu.core_type<tc>, window_params = [{transform_indices = @transform_0, window_bounds = array<i64: 8, 256>}, {pipeline_mode = #tpu.pipeline_mode<synchronous>, transform_indices = @transform_1, window_bounds = array<i64: 128, 256>}, {pipeline_mode = #tpu.pipeline_mode<synchronous>, transform_indices = @transform_2, window_bounds = array<i64: 128, 256>}, {pipeline_mode = #tpu.pipeline_mode<synchronous>, transform_indices = @transform_3, window_bounds = array<i64: 1, 128>}, {transform_indices = @transform_4, window_bounds = array<i64: 8, 256>}, {transform_indices = @transform_5, window_bounds = array<i64: 8, 128>}, {transform_indices = @transform_6, window_bounds = array<i64: 1, 8, 128>}]} {
    %c0 = arith.constant 0 : index
    %c0_0 = arith.constant 0 : index
    %0 = vector.load %arg1[%c0, %c0_0] : memref<8x256xf32, #tpu.memory_space<vmem>>, vector<8x256xf32>
    %1 = arith.truncf %0 : vector<8x256xf32> to vector<8x256xbf16>
    %c0_1 = arith.constant 0 : index
    %c0_2 = arith.constant 0 : index
    %2 = vector.load %arg3[%c0_1, %c0_2] : memref<128x256xbf16, #tpu.memory_space<vmem>>, vector<128x256xbf16>
    %cst = arith.constant dense<0.000000e+00> : vector<8x128xf32>
    %3 = tpu.matmul %1, %2, %cst {dimension_numbers = #tpu.dot_dimension_numbers<[1], [1], [0], [0], [0, 0, 1, 0], [], []>} : vector<8x256xbf16>, vector<128x256xbf16>, vector<8x128xf32> -> vector<8x128xf32>
    %4 = tpu.iota {dimensions = array<i32: 1>} : vector<8x128xi32>
    %c0_3 = arith.constant 0 : index
    %c0_4 = arith.constant 0 : index
    %5 = vector.load %arg4[%c0_3, %c0_4] : memref<1x128xf32, #tpu.memory_space<vmem>>, vector<1x128xf32>
    %cst_5 = arith.constant 2.000000e+00 : f32
    %6 = vector.broadcast %cst_5 : f32 to vector<8x128xf32>
    %7 = arith.mulf %6, %3 : vector<8x128xf32>
    %8 = vector.broadcast %5 : vector<1x128xf32> to vector<8x128xf32>
    %9 = arith.subf %8, %7 : vector<8x128xf32>
    %c96_i32 = arith.constant 96 : i32
    %10 = vector.broadcast %c96_i32 : i32 to vector<8x128xi32>
    %11 = arith.cmpi slt, %4, %10 : vector<8x128xi32>
    %cst_6 = arith.constant 3.000000e+38 : f32
    %12 = vector.broadcast %cst_6 : f32 to vector<8x128xf32>
    %13 = arith.select %11, %9, %12 : vector<8x128xi1>, vector<8x128xf32>
    %cst_7 = arith.constant dense<0x7F800000> : vector<8xf32>
    %14 = vector.multi_reduction <minimumf>, %13, %cst_7 [1] : vector<8x128xf32> to vector<8xf32>
    %15 = vector.shape_cast %14 : vector<8xf32> to vector<8x1xf32>
    %16 = vector.broadcast %15 : vector<8x1xf32> to vector<8x128xf32>
    %17 = arith.cmpf oeq, %13, %16 : vector<8x128xf32>
    %c128_i32 = arith.constant 128 : i32
    %18 = vector.broadcast %c128_i32 : i32 to vector<8x128xi32>
    %19 = arith.select %17, %4, %18 : vector<8x128xi1>, vector<8x128xi32>
    %cst_8 = arith.constant dense<2147483647> : vector<8xi32>
    %20 = vector.multi_reduction <minsi>, %19, %cst_8 [1] : vector<8x128xi32> to vector<8xi32>
    %21 = vector.shape_cast %20 : vector<8xi32> to vector<8x1xi32>
    %22 = vector.broadcast %21 : vector<8x1xi32> to vector<8x128xi32>
    %23 = arith.cmpi eq, %4, %22 : vector<8x128xi32>
    %24 = tpu.iota {dimensions = array<i32: 0>} : vector<8x128xi32>
    %c8_i32 = arith.constant 8 : i32
    %25 = arith.muli %arg0, %c8_i32 : i32
    %26 = vector.broadcast %25 : i32 to vector<8x128xi32>
    %27 = arith.addi %24, %26 : vector<8x128xi32>
    %c10_i32 = arith.constant 10 : i32
    %28 = vector.broadcast %c10_i32 : i32 to vector<8x128xi32>
    %29 = arith.cmpi slt, %27, %28 : vector<8x128xi32>
    %30 = arith.andi %23, %29 : vector<8x128xi1>
    %cst_9 = arith.constant 1.000000e+00 : f32
    %cst_10 = arith.constant 0.000000e+00 : f32
    %31 = vector.broadcast %cst_9 : f32 to vector<8x128xf32>
    %32 = vector.broadcast %cst_10 : f32 to vector<8x128xf32>
    %33 = arith.select %30, %31, %32 : vector<8x128xi1>, vector<8x128xf32>
    %c0_11 = arith.constant 0 : index
    %c0_12 = arith.constant 0 : index
    %34 = vector.load %arg6[%c0_11, %c0_12] : memref<8x128xf32, #tpu.memory_space<vmem>>, vector<8x128xf32>
    tpu.vector_store %arg6[%c0_11, %c0_12], %33 {strides = array<i32>} : memref<8x128xf32, #tpu.memory_space<vmem>>, vector<8x128xf32>,
    %c0_13 = arith.constant 0 : index
    %c0_14 = arith.constant 0 : index
    %35 = vector.load %arg2[%c0_13, %c0_14] : memref<128x256xf32, #tpu.memory_space<vmem>>, vector<128x256xf32>
    %cst_15 = arith.constant dense<0.000000e+00> : vector<8x256xf32>
    %36 = tpu.matmul %33, %35, %cst_15 {dimension_numbers = #tpu.dot_dimension_numbers<[1], [0], [0], [1], [0, 0, 1, 1], [], []>} : vector<8x128xf32>, vector<128x256xf32>, vector<8x256xf32> -> vector<8x256xf32>
    %c0_16 = arith.constant 0 : index
    %c0_17 = arith.constant 0 : index
    %37 = vector.load %arg5[%c0_16, %c0_17] : memref<8x256xf32, #tpu.memory_space<vmem>>, vector<8x256xf32>
    tpu.vector_store %arg5[%c0_16, %c0_17], %36 {strides = array<i32>} : memref<8x256xf32, #tpu.memory_space<vmem>>, vector<8x256xf32>,
    %38 = arith.subf %36, %0 : vector<8x256xf32>
    %39 = arith.mulf %38, %38 : vector<8x256xf32>
    %40 = vector.shape_cast %39 : vector<8x256xf32> to vector<1x8x256xf32>
    %cst_18 = arith.constant dense<0.000000e+00> : vector<1xf32>
    %41 = vector.multi_reduction <add>, %40, %cst_18 [1, 2] : vector<1x8x256xf32> to vector<1xf32>
    %42 = vector.shape_cast %41 : vector<1xf32> to vector<1x1x1xf32>
    %43 = vector.extract %42[0, 0, 0] : f32 from vector<1x1x1xf32>
    %cst_19 = arith.constant dense<0.000000e+00> : vector<128xf32>
    %44 = vector.multi_reduction <add>, %33, %cst_19 [0] : vector<8x128xf32> to vector<128xf32>
    %45 = tpu.iota {dimensions = array<i32: 0>} : vector<8x128xi32>
    %c0_i32 = arith.constant 0 : i32
    %46 = vector.broadcast %c0_i32 : i32 to vector<8x128xi32>
    %47 = arith.cmpi eq, %45, %46 : vector<8x128xi32>
    %48 = vector.shape_cast %44 : vector<128xf32> to vector<1x128xf32>
    %49 = vector.shape_cast %48 : vector<1x128xf32> to vector<1x128xf32>
    %50 = vector.broadcast %49 : vector<1x128xf32> to vector<8x128xf32>
    %51 = vector.broadcast %43 : f32 to vector<8x128xf32>
    %52 = arith.select %47, %50, %51 : vector<8x128xi1>, vector<8x128xf32>
    %53 = vector.shape_cast %52 : vector<8x128xf32> to vector<1x8x128xf32>
    %c0_20 = arith.constant 0 : index
    %c0_21 = arith.constant 0 : index
    %c0_22 = arith.constant 0 : index
    %54 = vector.load %arg7[%c0_20, %c0_21, %c0_22] : memref<1x8x128xf32, #tpu.memory_space<vmem>>, vector<1x8x128xf32>
    tpu.vector_store %arg7[%c0_20, %c0_21, %c0_22], %53 {strides = array<i32>} : memref<1x8x128xf32, #tpu.memory_space<vmem>>, vector<1x8x128xf32>,
    return
  }
  func.func @transform_0(%arg0: i32) -> (i32, i32) {
    %c0_i32 = arith.constant 0 : i32
    %c0_i32_0 = arith.constant 0 : i32
    return %arg0, %c0_i32 : i32, i32
  }
  func.func @transform_1(%arg0: i32) -> (i32, i32) {
    %c0_i32 = arith.constant 0 : i32
    %c0_i32_0 = arith.constant 0 : i32
    %c0_i32_1 = arith.constant 0 : i32
    return %c0_i32, %c0_i32_0 : i32, i32
  }
  func.func @transform_2(%arg0: i32) -> (i32, i32) {
    %c0_i32 = arith.constant 0 : i32
    %c0_i32_0 = arith.constant 0 : i32
    %c0_i32_1 = arith.constant 0 : i32
    return %c0_i32, %c0_i32_0 : i32, i32
  }
  func.func @transform_3(%arg0: i32) -> (i32, i32) {
    %c0_i32 = arith.constant 0 : i32
    %c0_i32_0 = arith.constant 0 : i32
    %c0_i32_1 = arith.constant 0 : i32
    return %c0_i32, %c0_i32_0 : i32, i32
  }
  func.func @transform_4(%arg0: i32) -> (i32, i32) {
    %c0_i32 = arith.constant 0 : i32
    %c0_i32_0 = arith.constant 0 : i32
    return %arg0, %c0_i32 : i32, i32
  }
  func.func @transform_5(%arg0: i32) -> (i32, i32) {
    %c0_i32 = arith.constant 0 : i32
    %c0_i32_0 = arith.constant 0 : i32
    return %arg0, %c0_i32 : i32, i32
  }
  func.func @transform_6(%arg0: i32) -> (i32, i32, i32) {
    %c0_i32 = arith.constant 0 : i32
    %c0_i32_0 = arith.constant 0 : i32
    %c0_i32_1 = arith.constant 0 : i32
    return %arg0, %c0_i32, %c0_i32_0 : i32, i32, i32
  }
}

</mosaic_0001>

<bundles_post_ra>
// kernel: tpu_custom_call.1
= control target key start
LH: loop header
LB: loop body
LE: loop exit
PB: predicated region body
PF: predicated region fallthrough
CT: control target
= control target key end

     0   :  { %12 = vsyncpa [#allocation3], 0  ;;  %s1611_s0 = inlined_call_operand.hbm [shape: f32[16,256], index: 0, kind: input, shape index: {}]   ;;  %s1612_s1 = inlined_call_operand.hbm [shape: f32[128,256], index: 1, kind: input, shape index: {}]   ;;  %s1613_s2 = inlined_call_operand.hbm [shape: bf16[128,256], index: 2, kind: input, shape index: {}]   ;;  %s1614_s3 = inlined_call_operand.vmem [shape: f32[1,128], index: 3, kind: input, shape index: {}]   ;;  %s1615_s4 = inlined_call_operand.hbm [shape: f32[16,256], index: 4, kind: output, shape index: {0}]   ;;  %s1616_s5 = inlined_call_operand.hbm [shape: f32[16,128], index: 5, kind: output, shape index: {1}]   ;;  %s1617_s6 = inlined_call_operand.hbm [shape: f32[2,8,128], index: 6, kind: output, shape index: {2}]  }
   0x1   :  { %14 = vsyncpa [#allocation3 + $0x1], 0 }
   0x2   :  { %15 = vsyncpa [#allocation6], 0 }
   0x3   :  { %16 = vsyncpa [#allocation4], 0 }
   0x4   :  { %18 = vsyncpa [#allocation4 + $0x1], 0 }
   0x5   :  { %19 = vsyncpa [#allocation10], 0 }
   0x6   :  { %21 = vsyncpa [#allocation10 + $0x1], 0  ;;  %s1278_s21 = smov 0   ;;  %s1280_s22 = smov 0  }
   0x7   :  { %s1282_s23 = smov 0   ;;  %s1284_s24 = smov 0  }
   0x8 LB: > { %s1299_s25 = sadd.s32 4294967295, %s1229_s24   ;;  %s1621_s26 = sadd.s32 4294967294, %s1229_s24   ;;  %s1229_s24 = sphi %s1284_s24, %s1643_s24   ;;  %s1225_s23 = sphi %s1282_s23, %s1642_s23   ;;  %s1221_s22 = sphi %s1280_s22, %s1641_s22   ;;  %s1217_s21 = sphi %s1278_s21, %s1640_s21  }
   0x9   : > { %p47_p0 = scmp.ne.s32.totalorder %s1221_s22, %s1217_s21  ;;  %p1618_p1 = scmp.eq.s32.totalorder %s1299_s25, 0 }
   0xa   : > { %p140_p3 = scmp.eq.s32.totalorder %s1621_s26, 1  ;;  %p828_p5 = scmp.ge.s32.totalorder %s1229_s24, 1 }
   0xb   : > { %p1310_p4 = por %p1618_p1, %p47_p0  ;;  %p199_p7 = scmp.lt.s32.totalorder %s1229_s24, 3 }
   0xc   : > { %p1315_p6 = por %p140_p3, %p47_p0  ;;  %s1231_s30 = smov [#allocation5]  }
   0xd   : > { %s1624_s27 = scalar_select %p1310_p4, 1, 0 }
   0xe   : > { %s1625_s28 = scalar_select %p1315_p6, 1, 0 }
   0xf   : > { %p1320_p8 = pnand %p828_p5, %p199_p7  ;;  %s211_s7 = sshll.u32 %s1231_s30, 4  ;;  %s1324_s7 = int_to_ptr.vmem [resolvable:$true] %s211_s7 }
  0x10   : > { %s1232_s9 = smov [#allocation7]   ;;  %s1013_s13 = scalar_lea.hbm %s1612_s1, 4096 }
  0x11   : > { %p922_p9 = pneg %p1320_p8  ;;  %s224_s10 = sshll.u32 %s1232_s9, 4  ;;  %s1335_s10 = int_to_ptr.vmem [resolvable:$true] %s224_s10 }
  0x12   : > { %p1014_p12 = scmp.ne.s32.totalorder %s1612_s1, %s1013_s13  ;;  %p1020_p5 = scmp.lt.u32.totalorder %s1013_s13, %s1612_s1 }
  0x13   : > { %p1331_p11 = pnand %p922_p9, %p1618_p1 }
  0x15   : > { %p1015_p13 = pneg %p1331_p11 }
  0x17   : > { %p1016_p0 = pnand %p1015_p13, %p1014_p12 }
  0x19   : > { %p1017_p3 = pneg %p1016_p0 }
  0x1b   : > { %p1022_p7 = pnand %p1020_p5, %p1017_p3 }
  0x1d   : > { %1025 = shalt.err (!%p1022_p7)
}
  0x1e   : > { %s1026_s18 = scalar_lea.vmem %s1324_s7, 4096  ;;  %p1034_p2 = scmp.lt.s32.totalorder %s1324_s7, %s1324_s7 }
  0x1f   : > { %p1027_p9 = scmp.ne.s32.totalorder %s1324_s7, %s1026_s18  ;;  %p1035_p12 = scmp.lt.s32.totalorder %s1026_s18, %s1026_s18 }
  0x21   : > { %p1029_p10 = pnand %p1027_p9, %p1015_p13  ;;  %p1036_p0 = por %p1035_p12, %p1034_p2 }
  0x23   : > { %p1030_p1 = pneg %p1029_p10 }
  0x25   : > { %p1037_p6 = pnand %p1036_p0, %p1030_p1 }
  0x27   : > { %1040 = shalt.err (!%p1037_p6)
}
  0x28   : > { %s1233_s19 = smov 256   ;;  %s1234_s20 = smov 16  }
  0x29   : > { %925 = dma.hbm_to_vmem [thread:$0]  (!%p1331_p11), %s1612_s1, 4096, %s1324_s7, [#allocation6], %s1233_s19, %s1233_s19, %s1234_s20  }
  0x2a   : > { %s1041_s13 = scalar_lea.hbm %s1613_s2, 2048 }
  0x2b   : > { %p1042_p2 = scmp.ne.s32.totalorder %s1613_s2, %s1041_s13  ;;  %p1048_p10 = scmp.lt.u32.totalorder %s1041_s13, %s1613_s2 }
  0x2d   : > { %p1044_p1 = pnand %p1042_p2, %p1015_p13 }
  0x2f   : > { %p1045_p6 = pneg %p1044_p1 }
  0x31   : > { %p1050_p3 = pnand %p1048_p10, %p1045_p6 }
  0x33   : > { %1053 = shalt.err (!%p1050_p3)
}
  0x34   : > { %s1054_s7 = scalar_lea.vmem %s1335_s10, 2048  ;;  %p1062_p12 = scmp.lt.s32.totalorder %s1335_s10, %s1335_s10 }
  0x35   : > { %p1055_p5 = scmp.ne.s32.totalorder %s1335_s10, %s1054_s7  ;;  %p1063_p0 = scmp.lt.s32.totalorder %s1054_s7, %s1054_s7 }
  0x37   : > { %p1057_p7 = pnand %p1055_p5, %p1015_p13  ;;  %p1064_p2 = por %p1063_p0, %p1062_p12 }
  0x39   : > { %p1058_p9 = pneg %p1057_p7 }
  0x3b   : > { %p1065_p1 = pnand %p1064_p2, %p1058_p9 }
  0x3d   : > { %1068 = shalt.err (!%p1065_p1)
}
  0x3e   : > { %s1235_s18 = smov 128   ;;  %s1236_s19 = smov 8  }
  0x3f   : > { %928 = dma.hbm_to_vmem [thread:$0]  (!%p1331_p11), %s1613_s2, 2048, %s1335_s10, [#allocation6], %s1235_s18, %s1235_s18, %s1236_s19  }
  0x40   : > { %s1390_s9 = sadd.s32 1, %s1229_s24   ;;  %s34_s12 = sadd.s32 1, %s1225_s23 }
  0x41   : > { %s31_s11 = ssub.s32 %s1229_s24, %s1390_s9  ;;  %p41_p6 = scmp.ne.s32.totalorder %s1225_s23, %s1221_s22 }
  0x42   : > { %p32_p13 = scmp.eq.s32.totalorder %s31_s11, 0  ;;  %p42_p10 = scmp.eq.s32.totalorder %s1229_s24, 0 }
  0x43   : > { %p1628_p5 = scmp.eq.s32.totalorder %s1299_s25, 1  ;;  %p945_p9 = scmp.lt.s32.totalorder %s1229_s24, 2 }
  0x44   : > { %s1399_s13 = scalar_select %p32_p13, %s1225_s23, %s34_s12  }
  0x45   : > { %p43_p3 = por %p42_p10, %p41_p6  ;;  %p1403_p7 = por %p1628_p5, %p41_p6 }
  0x46   : > { %s241_s8 = sand.u32 1, %s1225_s23   ;;  %s870_s10 = sshll.u32 %s1229_s24, 8 }
  0x47   : > { %s1629_s14 = scalar_select %p1403_p7, 1, 0 }
  0x48   : > { %s832_s15 = sshll.u32 %s241_s8, 4  ;;  %s1413_s7 = scalar_lea.hbm %s1611_s0, %s870_s10 }
  0x49   : > { %s245_s18 = scalar_lea.vmem [#allocation2], %s832_s15  ;;  %p1417_p11 = pnand %p945_p9, %p43_p3 }
  0x4a   : > { %s253_s19 = sshll.u32 %s245_s18, 4  ;;  %s242_s30 = scalar_lea.sflag [#allocation3], %s241_s8  ;;  %s1415_s19 = int_to_ptr.vmem [resolvable:$true] %s253_s19 }
  0x4b   : > { %s1069_s11 = scalar_lea.hbm %s1413_s7, 256  ;;  %p1071_p0 = pneg %p1417_p11 }
  0x4c   : > { %p1070_p12 = scmp.ne.s32.totalorder %s1413_s7, %s1069_s11  ;;  %s1074_s10 = scalar_lea.hbm %s1611_s0, 512 }
  0x4d   : > { %p1075_p13 = scmp.lt.u32.totalorder %s1413_s7, %s1611_s0  ;;  %p1076_p6 = scmp.lt.u32.totalorder %s1074_s10, %s1069_s11 }
  0x4e   : > { %p1072_p2 = pnand %p1071_p0, %p1070_p12  ;;  %p1078_p3 = scmp.lt.u32.totalorder %s1069_s11, %s1413_s7 }
  0x4f   : > { %p1077_p10 = por %p1076_p6, %p1075_p13 }
  0x50   : > { %p1073_p1 = pneg %p1072_p2 }
  0x51   : > { %p1079_p5 = por %p1078_p3, %p1077_p10 }
  0x53   : > { %p1080_p9 = pnand %p1079_p5, %p1073_p1 }
  0x55   : > { %1083 = shalt.err (!%p1080_p9)
}
  0x56   : > { %s1084_s8 = scalar_lea.vmem %s1415_s19, 256  ;;  %s1237_s18 = smov [#allocation2]  }
  0x57   : > { %p1085_p12 = scmp.ne.s32.totalorder %s1415_s19, %s1084_s8  ;;  %s1089_s12 = sshll.u32 %s1237_s18, 4  ;;  %s1090_s12 = int_to_ptr.vmem [resolvable:$false] %s1089_s12 }
  0x58   : > { %s1091_s15 = scalar_lea.vmem %s1090_s12, 512  ;;  %p1092_p4 = scmp.lt.s32.totalorder %s1415_s19, %s1090_s12 }
  0x59   : > { %p1087_p2 = pnand %p1085_p12, %p1071_p0  ;;  %p1093_p13 = scmp.lt.s32.totalorder %s1091_s15, %s1084_s8 }
  0x5b   : > { %p1088_p7 = pneg %p1087_p2  ;;  %p1094_p6 = por %p1093_p13, %p1092_p4 }
  0x5d   : > { %p1095_p10 = pnand %p1094_p6, %p1088_p7 }
  0x5f   : > { %1098 = shalt.err (!%p1095_p10)
}
  0x60   : > { %932 = dma.hbm_to_vmem [thread:$0]  (!%p1417_p11), %s1413_s7, 256, %s1415_s19, %s242_s30  }
  0x61   : > { %262 = sbr.rel (%p1320_p8) target bundleno = 1269 (0x4f5), region = 36  ;;  %s1449_s11 = sand.u32 (!%p1320_p8), 1, %s1221_s22  }
  0x62   : > { %s836_s10 = sshll.u32 (!%p1320_p8), %s1449_s11, 4  ;;  %s265_s16 = scalar_lea.sflag (!%p1320_p8), [#allocation3], %s1449_s11 }
  0x63   : > { %s1455_s17 = scalar_lea.vmem (!%p1320_p8), [#allocation2], %s836_s10  ;;  %p1631_p4 = scmp.ne.s32.totalorder (!%p1320_p8), %s1624_s27, 0 }
  0x68   : > { %1200 = dma.done.wait (%p1631_p4), %s265_s16, 256  }
  0x69   : > { %1202 = vsyncadd (%p1631_p4), %s265_s16, 4294967040  ;;  %p1632_p7 = scmp.eq.s32.totalorder %s1299_s25, 0 }
  0x6b   : > { %1204 = dma.done.wait (%p1632_p7), [#allocation6], 6144   ;;  %p1633_p8 = pmov %p1632_p7 }
  0x6c   : > { %v989_v0 = vld [vmem:[#allocation7 + $0x4] ss:$8 sps:$4 sm:$0xff]   ;;  %v991_v1 = vld [vmem:[#allocation7] ss:$8 sps:$4 sm:$0xff]   ;;  %v992_v2 = vld [vmem:[#allocation7 + $0x14] ss:$8 sps:$4 sm:$0xff]   ;;  %v456_v20 = vlaneseq }
  0x6d   : > { %1206 = vsyncadd (%p1633_p8), [#allocation6], 4294961152  ;;  %416 = vmatprep.subr.bf16.mxu0 %v989_v0  ;;  %v994_v3 = vld [vmem:[#allocation7 + $0x10] ss:$8 sps:$4 sm:$0xff]   ;;  %v995_v4 = vld [vmem:[#allocation7 + $0x24] ss:$8 sps:$4 sm:$0xff]  }
  0x6e   : > { %417 = vmatpush1.bf16.xpose.msra.mxu0 %v991_v1  ;;  %v1466_v5 = vld [vmem:[%s1455_s17 + $0x8] sm:$0xff]  ;;  %v1471_v18 = vld [vmem:[%s1455_s17] sm:$0xff]  ;;  %v1476_v21 = vand.u32 127, %v456_v20  ;;  %s859_s7 = sshll.u32 %s1299_s25, 3  ;;  %s1623_s19 = sshll.u32 %s1449_s11, 3 }
  0x6f   : > { %418 = vmatprep.subr.bf16.mxu0 %v992_v2  ;;  %v319_v6 = vpack.c.bf16 %v1466_v5, %v1466_v5  ;;  %v997_v7 = vld [vmem:[#allocation7 + $0x20] ss:$8 sps:$4 sm:$0xff]   ;;  %v998_v8 = vld [vmem:[#allocation7 + $0x34] ss:$8 sps:$4 sm:$0xff]   ;;  %v1000_v9 = vld [vmem:[#allocation7 + $0x30] ss:$8 sps:$4 sm:$0xff]   ;;  %v318_v19 = vpack.c.bf16 %v1471_v18, %v1471_v18 }
  0x70   : > { %v1001_v10 = vld [vmem:[#allocation7 + $0x44] ss:$8 sps:$4 sm:$0xff]   ;;  %v1003_v11 = vld [vmem:[#allocation7 + $0x40] ss:$8 sps:$4 sm:$0xff]   ;;  %v1004_v12 = vld [vmem:[#allocation7 + $0x54] ss:$8 sps:$4 sm:$0xff]  }
  0x71   : > { %448 = vmatprep.mubr.bf16.mxu0 %v319_v6  ;;  %v1006_v13 = vld [vmem:[#allocation7 + $0x50] ss:$8 sps:$4 sm:$0xff]   ;;  %v1007_v14 = vld [vmem:[#allocation7 + $0x64] ss:$8 sps:$4 sm:$0xff]   ;;  %v1009_v15 = vld [vmem:[#allocation7 + $0x60] ss:$8 sps:$4 sm:$0xff]  }
  0x72   : > { %v1010_v16 = vld [vmem:[#allocation7 + $0x74] ss:$8 sps:$4 sm:$0xff]   ;;  %v1012_v17 = vld [vmem:[#allocation7 + $0x70] ss:$8 sps:$4 sm:$0xff]   ;;  %v858_v23 = vld [vmem:[%s1614_s3] ss:$0 sm:$0xff] }
  0x73   : > { %vm467_vm0 = vcmp.lt.s32.totalorder %v1476_v21, 96  ;;  %v498_v34 = vld [vmem:[#allocation5 + $0x8] sm:$0xff]  ;;  %v500_v35 = vld [vmem:[#allocation5 + $0x18] sm:$0xff]  ;;  %v497_v36 = vld [vmem:[#allocation5] sm:$0xff]  ;;  %s307_s20 = scalar_lea.vmem [#allocation9], %s1623_s19  ;;  %s300_s30 = scalar_lea.vmem [#allocation8], %s836_s10 }
  0x74   : > { %v872_v37 = vpack.c.bf16 %v500_v35, %v498_v34  ;;  %v499_v38 = vld [vmem:[#allocation5 + $0x10] sm:$0xff]  ;;  %v502_v39 = vld [vmem:[#allocation5 + $0x28] sm:$0xff]  ;;  %v504_v40 = vld [vmem:[#allocation5 + $0x38] sm:$0xff]  ;;  %s651_s8 = sshll.u32 %s300_s30, 4  ;;  %s631_s18 = sand.u32 1, %s1299_s25   ;;  %s1512_s8 = int_to_ptr.vmem [resolvable:$true] %s651_s8 }
  0x75   : > { %v874_v41 = vpack.c.bf16 %v499_v38, %v497_v36  ;;  %v876_v42 = vpack.c.bf16 %v504_v40, %v502_v39  ;;  %v501_v43 = vld [vmem:[#allocation5 + $0x20] sm:$0xff]  ;;  %v503_v44 = vld [vmem:[#allocation5 + $0x30] sm:$0xff]  ;;  %v506_v45 = vld [vmem:[#allocation5 + $0x48] sm:$0xff]  ;;  %v1239_v36 = vmov 1.0   ;;  %s1622_s12 = sshll.u32 %s1299_s25, 7  ;;  %s664_s17 = sshll.u32 %s307_s20, 4  ;;  %s665_s17 = int_to_ptr.vmem [resolvable:$true] %s664_s17 }
  0x76   : > { %419 = vmatpush1.bf16.xpose.msra.mxu0 %v994_v3  ;;  %873 = vmatprep.subr.bf16.mxu1 %v872_v37  ;;  %v508_v46 = vld [vmem:[#allocation5 + $0x58] sm:$0xff]  ;;  %v878_v47 = vpack.c.bf16 %v503_v44, %v501_v43  ;;  %v505_v49 = vld [vmem:[#allocation5 + $0x40] sm:$0xff]  ;;  %v507_v50 = vld [vmem:[#allocation5 + $0x50] sm:$0xff]  ;;  %s1510_s10 = scalar_lea.hbm %s1616_s5, %s1622_s12  ;;  %s1514_s27 = scalar_lea.sflag [#allocation10], %s631_s18 }
  0x77   : > { %420 = vmatprep.subr.bf16.mxu0 %v995_v4  ;;  %875 = vmatpush1.bf16.msra.mxu1 %v874_v41  ;;  %v880_v48 = vpack.c.bf16 %v508_v46, %v506_v45  ;;  %v510_v51 = vld [vmem:[#allocation5 + $0x68] sm:$0xff]  ;;  %v512_v52 = vld [vmem:[#allocation5 + $0x78] sm:$0xff]  ;;  %v882_v53 = vpack.c.bf16 %v507_v50, %v505_v49  ;;  %v509_v55 = vld [vmem:[#allocation5 + $0x60] sm:$0xff]  ;;  %s1099_s29 = scalar_lea.vmem %s665_s17, 128  ;;  %p1634_p0 = scmp.ne.s32.totalorder %s1629_s14, 0 }
  0x78   : > { %877 = vmatprep.subr.bf16.mxu1 %v876_v42  ;;  %v884_v54 = vpack.c.bf16 %v512_v52, %v510_v51  ;;  %v511_v56 = vld [vmem:[#allocation5 + $0x70] sm:$0xff]  ;;  %v514_v57 = vld [vmem:[#allocation5 + $0x88] sm:$0xff]  ;;  %v516_v58 = vld [vmem:[#allocation5 + $0x98] sm:$0xff]  ;;  %p1100_p11 = scmp.ne.s32.totalorder %s665_s17, %s1099_s29 }
  0x79   : > { %v886_v59 = vpack.c.bf16 %v511_v56, %v509_v55  ;;  %v888_v60 = vpack.c.bf16 %v516_v58, %v514_v57  ;;  %v513_v61 = vld [vmem:[#allocation5 + $0x80] sm:$0xff]  ;;  %v515_v62 = vld [vmem:[#allocation5 + $0x90] sm:$0xff]  ;;  %v518_v63 = vld [vmem:[#allocation5 + $0xa8] sm:$0xff] }
  0x7a   : > { %v520_v0 = vld [vmem:[#allocation5 + $0xb8] sm:$0xff]  ;;  %v890_v1 = vpack.c.bf16 %v515_v62, %v513_v61  ;;  %v517_v3 = vld [vmem:[#allocation5 + $0xa0] sm:$0xff]  ;;  %v519_v4 = vld [vmem:[#allocation5 + $0xb0] sm:$0xff]  ;;  %p1101_p1 = pnand %p1100_p11, %p1634_p0 }
  0x7b   : > { %879 = vmatpush1.bf16.msra.mxu1 %v878_v47  ;;  %v892_v2 = vpack.c.bf16 %v520_v0, %v518_v63  ;;  %v522_v6 = vld [vmem:[#allocation5 + $0xc8] sm:$0xff] }
  0x7c   : > { %881 = vmatprep.subr.bf16.mxu1 %v880_v48  ;;  %p1102_p3 = pneg %p1101_p1 }
  0x7e   : > { %421 = vmatpush1.bf16.xpose.msra.mxu0 %v997_v7  ;;  %v524_v7 = vld [vmem:[#allocation5 + $0xd8] sm:$0xff] }
  0x7f   : > { %422 = vmatprep.subr.bf16.mxu0 %v998_v8  ;;  %883 = vmatpush1.bf16.msra.mxu1 %v882_v53  ;;  %v894_v8 = vpack.c.bf16 %v519_v4, %v517_v3 }
  0x80   : > { %885 = vmatprep.subr.bf16.mxu1 %v884_v54 }
  0x83   : > { %887 = vmatpush1.bf16.msra.mxu1 %v886_v59 }
  0x84   : > { %889 = vmatprep.subr.bf16.mxu1 %v888_v60 }
  0x86   : > { %423 = vmatpush1.bf16.xpose.msra.mxu0 %v1000_v9  ;;  %v896_v9 = vpack.c.bf16 %v524_v7, %v522_v6 }
  0x87   : > { %424 = vmatprep.subr.bf16.mxu0 %v1001_v10  ;;  %891 = vmatpush1.bf16.msra.mxu1 %v890_v1  ;;  %v521_v10 = vld [vmem:[#allocation5 + $0xc0] sm:$0xff] }
  0x88   : > { %893 = vmatprep.subr.bf16.mxu1 %v892_v2 }
  0x8b   : > { %895 = vmatpush1.bf16.msra.mxu1 %v894_v8 }
  0x8c   : > { %897 = vmatprep.subr.bf16.mxu1 %v896_v9 }
  0x8e   : > { %425 = vmatpush1.bf16.xpose.msra.mxu0 %v1003_v11  ;;  %v523_v11 = vld [vmem:[#allocation5 + $0xd0] sm:$0xff] }
  0x8f   : > { %426 = vmatprep.subr.bf16.mxu0 %v1004_v12  ;;  %v898_v12 = vpack.c.bf16 %v523_v11, %v521_v10 }
  0x91   : > { %899 = vmatpush1.bf16.msra.mxu1 %v898_v12 }
  0x96   : > { %427 = vmatpush1.bf16.xpose.msra.mxu0 %v1006_v13 }
  0x97   : > { %428 = vmatprep.subr.bf16.mxu0 %v1007_v14 }
  0x9e   : > { %429 = vmatpush1.bf16.xpose.msra.mxu0 %v1009_v15 }
  0x9f   : > { %430 = vmatprep.subr.bf16.mxu0 %v1010_v16 }
  0xa6   : > { %431 = vmatpush1.bf16.xpose.msra.mxu0 %v1012_v17  ;;  %v526_v17 = vld [vmem:[#allocation5 + $0xe8] sm:$0xff] }
  0xad   : > { %449 = vmatmul.mubr.bf16.vlgmr.msra.gmra.mrb[0].mxu0 %v318_v19  ;;  %v528_v19 = vld [vmem:[#allocation5 + $0xf8] sm:$0xff] }
 0x180   : > { %v450_v22 = vpop.f32.mrb[0].mxu0 }
 0x181   : > { %v459_v24 = vmul.f32 2.0, %v450_v22  ;;  %v452_v25 = vpop.f32.mrb[1].mxu0  ;;  %v900_v22 = vpack.c.bf16 %v528_v19, %v526_v17 }
 0x182   : > { %v453_v26 = vpop.f32.mrb[2].mxu0 }
 0x183   : > { %v454_v27 = vpop.f32.mrb[3].mxu0  ;;  %v466_v28 = vsub.f32 %v858_v23, %v459_v24  ;;  %v525_v23 = vld [vmem:[#allocation5 + $0xe0] sm:$0xff]  ;;  %v527_v24 = vld [vmem:[#allocation5 + $0xf0] sm:$0xff]  ;;  %901 = vmatprep.subr.bf16.mxu1 %v900_v22  ;;  %v1238_v26 = vmov 0.0  }
 0x184   : > { %v902_v25 = vpack.c.bf16 %v527_v24, %v525_v23  ;;  %593 = vmatprep.mubr.f32.mxu1 %v1238_v26  ;;  %v1489_v27 = vshrl.u32 %v456_v20, 7 }
 0x185   : > { %v468_v29 = vsel %vm467_vm0, %v466_v28, 3e+38  ;;  %v491_v28 = vstv %s859_s7  ;;  %s1240_s7 = smov [#allocation9]  }
 0x186   : > { %469 = vmin.xlane.f32.xlu0 %v468_v29  ;;  %903 = vmatpush1.bf16.msra.mxu1 %v902_v25 }
 0x213   : > { %v470_v30 = vpop.xlane.xlu0 %469 }
 0x214   : > { %vm471_vm1 = vcmp.eq.f32.partialorder %v468_v29, %v470_v30  ;;  %v492_v30 = vadd.s32 %v491_v28, %v1489_v27 }
 0x215   : > { %v472_v31 = vsel %vm471_vm1, %v1476_v21, 128 }
 0x216   : > { %v474_v32 = vshra.s32 %v472_v31, 16  ;;  %v473_v13 = vand.u32 65535, %v472_v31  ;;  %vm493_vm3 = vcmp.lt.s32.totalorder %v492_v30, 10 }
 0x218   : > { %v1483_v33 = vcvt.s32.f32 %v474_v32  ;;  %v475_v15 = vcvt.s32.f32 %v473_v13 }
 0x21a   : > { %477 = vmin.xlane.f32.xlu0 %v1483_v33 }
 0x2a7   : > { %v478_v14 = vpop.xlane.xlu0 %477 }
 0x2a8   : > { %vm479_vm2 = vcmp.eq.f32.partialorder %v1483_v33, %v478_v14  ;;  %v484_v29 = vcvt.f32.s32 %v478_v14 }
 0x2a9   : > { %v480_v16 = vsel %vm479_vm2, %v475_v15, inf }
 0x2aa   : > { %481 = vmin.xlane.f32.xlu1 %v480_v16  ;;  %v485_v32 = vshll.u32 %v484_v29, 16 }
 0x337   : > { %v482_v31 = vpop.xlane.xlu1 %481 }
 0x338   : > { %v483_v33 = vcvt.f32.s32 %v482_v31 }
 0x33a   : > { %v486_v34 = vadd.s32 %v485_v32, %v483_v33 }
 0x33c   : > { %vm487_vm4 = vcmp.eq.s32.totalorder %v1476_v21, %v486_v34 }
 0x33d   : > { %vm494_vm5 = vmand %vm487_vm4, %vm493_vm3 }
 0x33e   : > { %v1494_v35 = vsel %vm494_vm5, 1.0, %v1238_v26  ;;  %860 = vmatmul.mubr.msk.f32.vlgmr.msra.gmra.mrb[0].mxu1 %vm494_vm5, %v1239_v36 }
 0x33f   : > { %496 = vst [vmem:[%s307_s20] sm:$0xff] %v1494_v35 }
 0x411   : > { %v595_v20 = vpop.f32.mrb[0].mxu1 }
 0x412   : > { %600 = vst [vmem:[%s300_s30] sm:$0xff] %v595_v20  ;;  %v602_v37 = vsub.f32 %v595_v20, %v1471_v18  ;;  %v597_v38 = vpop.f32.mrb[1].mxu1 }
 0x413   : > { %601 = vst [vmem:[%s300_s30 + $0x8] sm:$0xff] %v597_v38  ;;  %v603_v21 = vsub.f32 %v597_v38, %v1466_v5  ;;  %s1103_s30 = sshll.u32 %s1240_s7, 4  ;;  %s1104_s30 = int_to_ptr.vmem [resolvable:$false] %s1103_s30 }
 0x414   : > { %v604_v39 = vmul.f32 %v602_v37, %v602_v37  ;;  %s1105_s26 = scalar_lea.vmem %s1104_s30, 256  ;;  %p1106_p5 = scmp.lt.s32.totalorder %s665_s17, %s1104_s30 }
 0x415   : > { %v605_v40 = vmul.f32 %v603_v21, %v603_v21  ;;  %p1107_p9 = scmp.lt.s32.totalorder %s1105_s26, %s1099_s29 }
 0x417   : > { %v606_v41 = vadd.f32 %v605_v40, %v604_v39  ;;  %p1108_p12 = por %p1107_p9, %p1106_p5 }
 0x419   : > { %607 = vadd.xlane.f32.xlu1 %v606_v41  ;;  %p1109_p2 = pnand %p1108_p12, %p1102_p3 }
 0x41b   : > { %1112 = shalt.err (!%p1109_p2)
}
 0x41c   : > { %s1113_s20 = scalar_lea.hbm %s1510_s10, 128  ;;  %s1117_s16 = scalar_lea.hbm %s1616_s5, 256 }
 0x41d   : > { %p1114_p13 = scmp.ne.s32.totalorder %s1510_s10, %s1113_s20  ;;  %p1118_p4 = scmp.lt.u32.totalorder %s1510_s10, %s1616_s5 }
 0x41e   : > { %p1119_p7 = scmp.lt.u32.totalorder %s1117_s16, %s1113_s20  ;;  %p1121_p11 = scmp.lt.u32.totalorder %s1113_s20, %s1510_s10 }
 0x41f   : > { %p1115_p6 = pnand %p1114_p13, %p1634_p0 }
 0x420   : > { %p1120_p8 = por %p1119_p7, %p1118_p4 }
 0x421   : > { %p1116_p10 = pneg %p1115_p6 }
 0x422   : > { %p1122_p1 = por %p1121_p11, %p1120_p8 }
 0x424   : > { %p1123_p3 = pnand %p1122_p1, %p1116_p10 }
 0x426   : > { %1126 = shalt.err (!%p1123_p3)
}
 0x427   : > { %917 = dma.vmem_to_hbm [thread:$0]  (%p1634_p0), %s665_s17, 128, %s1510_s10, %s1514_s27  }
 0x428   : > { %s871_s26 = sshll.u32 %s1299_s25, 8  ;;  %s627_s20 = scalar_lea.sflag [#allocation4], %s1449_s11 }
 0x429   : > { %s649_s15 = scalar_lea.hbm %s1615_s4, %s871_s26  ;;  %s1127_s16 = scalar_lea.vmem %s1512_s8, 256 }
 0x42a   : > { %p1128_p5 = scmp.ne.s32.totalorder %s1512_s8, %s1127_s16  ;;  %s1241_s7 = smov [#allocation8]  }
 0x42b   : > { %s1131_s30 = sshll.u32 %s1241_s7, 4  ;;  %s1132_s30 = int_to_ptr.vmem [resolvable:$false] %s1131_s30 }
 0x42c   : > { %p1129_p9 = pnand %p1128_p5, %p1634_p0  ;;  %s1133_s12 = scalar_lea.vmem %s1132_s30, 512 }
 0x42d   : > { %p1134_p2 = scmp.lt.s32.totalorder %s1512_s8, %s1132_s30  ;;  %p1135_p13 = scmp.lt.s32.totalorder %s1133_s12, %s1127_s16 }
 0x42e   : > { %p1130_p12 = pneg %p1129_p9 }
 0x42f   : > { %p1136_p6 = por %p1135_p13, %p1134_p2 }
 0x431   : > { %p1137_p10 = pnand %p1136_p6, %p1130_p12 }
 0x433   : > { %1140 = shalt.err (!%p1137_p10)
}
 0x434   : > { %s1141_s10 = scalar_lea.hbm %s649_s15, 256  ;;  %s1145_s29 = scalar_lea.hbm %s1615_s4, 512 }
 0x435   : > { %p1142_p4 = scmp.ne.s32.totalorder %s649_s15, %s1141_s10  ;;  %p1146_p11 = scmp.lt.u32.totalorder %s649_s15, %s1615_s4 }
 0x436   : > { %p1147_p1 = scmp.lt.u32.totalorder %s1145_s29, %s1141_s10  ;;  %p1149_p5 = scmp.lt.u32.totalorder %s1141_s10, %s649_s15 }
 0x437   : > { %p1143_p7 = pnand %p1142_p4, %p1634_p0 }
 0x438   : > { %p1148_p3 = por %p1147_p1, %p1146_p11 }
 0x439   : > { %p1144_p8 = pneg %p1143_p7 }
 0x43a   : > { %p1150_p9 = por %p1149_p5, %p1148_p3 }
 0x43c   : > { %p1151_p12 = pnand %p1150_p9, %p1144_p8 }
 0x43e   : > { %1154 = shalt.err (!%p1151_p12)
}
 0x43f   : > { %916 = dma.vmem_to_hbm [thread:$0]  (%p1634_p0), %s1512_s8, 256, %s649_s15, %s627_s20   ;;  %v616_v47 = vrot.slane %v1494_v35, 4  ;;  %vm622_vm6 = vcmp.eq.s32.totalorder %v1489_v27, 0 }
 0x440   : > { %s1635_s19 = sshll.u32 %s1449_s11, 3  ;;  %s1636_s20 = sshll.u32 %s1299_s25, 7 }
 0x441   : > { %v617_v48 = vadd.f32 %v616_v47, %v1494_v35  ;;  %s314_s12 = scalar_lea.vmem [#allocation11], %s1635_s19  ;;  %s1567_s30 = scalar_lea.hbm %s1617_s6, %s1636_s20 }
 0x442   : > { %s677_s8 = sshll.u32 %s314_s12, 4  ;;  %s1242_s10 = smov [#allocation11]   ;;  %s1560_s8 = int_to_ptr.vmem [resolvable:$true] %s677_s8 }
 0x443   : > { %v618_v49 = vrot.slane %v617_v48, 2  ;;  %s1155_s11 = scalar_lea.vmem %s1560_s8, 128  ;;  %s1159_s17 = sshll.u32 %s1242_s10, 4  ;;  %s1160_s17 = int_to_ptr.vmem [resolvable:$false] %s1159_s17 }
 0x444   : > { %p1156_p2 = scmp.ne.s32.totalorder %s1560_s8, %s1155_s11  ;;  %s1161_s26 = scalar_lea.vmem %s1160_s17, 256 }
 0x445   : > { %v619_v50 = vadd.f32 %v618_v49, %v617_v48  ;;  %p1162_p10 = scmp.lt.s32.totalorder %s1560_s8, %s1160_s17  ;;  %p1163_p4 = scmp.lt.s32.totalorder %s1161_s26, %s1155_s11 }
 0x446   : > { %p1157_p13 = pnand %p1156_p2, %p1634_p0 }
 0x447   : > { %v620_v51 = vrot.slane %v619_v50, 1  ;;  %p1164_p7 = por %p1163_p4, %p1162_p10 }
 0x448   : > { %p1158_p6 = pneg %p1157_p13 }
 0x449   : > { %v621_v52 = vadd.f32 %v620_v51, %v619_v50 }
 0x44a   : > { %p1165_p8 = pnand %p1164_p7, %p1158_p6 }
 0x4a6   : > { %v608_v5 = vpop.xlane.xlu1 %607 }
 0x4a7   : > { %v609_v18 = vrot.slane %v608_v5, 4 }
 0x4a9   : > { %v610_v42 = vadd.f32 %v609_v18, %v608_v5 }
 0x4ab   : > { %v611_v43 = vrot.slane %v610_v42, 2 }
 0x4ad   : > { %v612_v44 = vadd.f32 %v611_v43, %v610_v42 }
 0x4af   : > { %v613_v45 = vrot.slane %v612_v44, 1 }
 0x4b1   : > { %v614_v46 = vadd.f32 %v613_v45, %v612_v44 }
 0x4b3   : > { %904 = vpush %v614_v46 }
 0x4e4   : > { %s905_s15 = spop %904 }
 0x4e5   : > { %v623_v53 = vstv %s905_s15 }
 0x4e6   : > { %v624_v54 = vsel %vm622_vm6, %v621_v52, %v623_v53 }
 0x4e7   : > { %625 = vst [vmem:[%s314_s12] sm:$0xff] %v624_v54 }
 0x4e8   : > { %1168 = shalt.err (!%p1165_p8)
}
 0x4e9   : > { %s1169_s25 = scalar_lea.hbm %s1567_s30, 128  ;;  %s1173_s19 = scalar_lea.hbm %s1617_s6, 256 }
 0x4ea   : > { %p1170_p11 = scmp.ne.s32.totalorder %s1567_s30, %s1169_s25  ;;  %p1174_p5 = scmp.lt.u32.totalorder %s1567_s30, %s1617_s6 }
 0x4eb   : > { %p1175_p9 = scmp.lt.u32.totalorder %s1173_s19, %s1169_s25  ;;  %p1177_p2 = scmp.lt.u32.totalorder %s1169_s25, %s1567_s30 }
 0x4ec   : > { %p1171_p1 = pnand %p1170_p11, %p1634_p0 }
 0x4ed   : > { %p1176_p12 = por %p1175_p9, %p1174_p5 }
 0x4ee   : > { %p1172_p3 = pneg %p1171_p1 }
 0x4ef   : > { %p1178_p13 = por %p1177_p2, %p1176_p12 }
 0x4f1   : > { %p1179_p6 = pnand %p1178_p13, %p1172_p3 }
 0x4f3   : > { %1182 = shalt.err (!%p1179_p6)
}
 0x4f4   : > { %918 = dma.vmem_to_hbm [thread:$0]  (%p1634_p0), %s1560_s8, 128, %s1567_s30, %s1514_s27  }
 0x4f5 PF: > { %s689_s20 = sand.u32 1, %s1217_s21   ;;  %p1637_p10 = scmp.ne.s32.totalorder %s1625_s28, 0 }
 0x4f6   : > { %p1638_p4 = scmp.ge.s32.totalorder %s1229_s24, 2  ;;  %s690_s16 = scalar_lea.sflag [#allocation4], %s689_s20 }
 0x4f8   : > { %p934_p7 = pnand %p1638_p4, %p1637_p10 }
 0x4fa   : > { %1208 = dma.done.wait (!%p934_p7), %s690_s16, 256  }
 0x4fb   : > { %1210 = vsyncadd (!%p934_p7), %s690_s16, 4294967040  ;;  %s1639_s7 = sadd.s32 4294967294, %s1229_s24  }
 0x4fc   : > { %s698_s11 = sand.u32 1, %s1639_s7  }
 0x4fd   : > { %s699_s10 = scalar_lea.sflag [#allocation10], %s698_s11 }
 0x4fe   : > { %1212 = dma.done.wait (!%p934_p7), %s699_s10, 256  }
 0x4ff   : > { %1214 = vsyncadd (!%p934_p7), %s699_s10, 4294967040  ;;  %p24_p0 = scmp.ge.s32.totalorder %s1390_s9, 4   ;;  %s1640_s21 = smov %s1221_s22 }
 0x500   : > { %s1641_s22 = smov %s1225_s23  ;;  %s1642_s23 = smov %s1399_s13 }
 0x501   : > { %s1643_s24 = smov %s1390_s9  ;;  %26 = sbr.rel (!%p24_p0) target bundleno = 8 (0x8), region = 121 }
 0x508   :  { %713 = vsyncpa [#allocation3], 1 }
 0x509   :  { %715 = vsyncpa [#allocation3 + $0x1], 1 }
 0x50a   :  { %716 = vsyncpa [#allocation6], 1 }
 0x50b   :  { %717 = vsyncpa [#allocation4], 1 }
 0x50c   :  { %719 = vsyncpa [#allocation4 + $0x1], 1 }
 0x50d   :  { %720 = vsyncpa [#allocation10], 1 }
 0x50e   :  { %722 = vsyncpa [#allocation10 + $0x1], 1 }

</bundles_post_ra>
